<compile_context>
chip_gen: v7x
topology: tpu7x:2x2x1
jax: 0.10.0
libtpu: 0.0.40
codegen_flags: <defaults>
</compile_context>

<pallas_src>
import functools

import jax
import jax.numpy as jnp
from jax import lax
from jax.experimental import pallas as pl
from jax.experimental.pallas import tpu as pltpu


def _rmsnorm_kernel(x_ref, o_ref, *, eps: float, hidden: int, lane_chunk: int):
    """Plain path (H >= 128 or non-foldable): per-row reduction over lanes.

    Two passes over x_ref (reduce, then normalize+store) in static lane chunks,
    so the compiler never needs a whole-tile f32 upcast temporary.
    """
    n_chunks = (hidden + lane_chunk - 1) // lane_chunk  # static Python int
    tile_r = x_ref.shape[0]

    ss = jnp.zeros((tile_r, 1), jnp.float32)
    for c in range(n_chunks):
        lo = c * lane_chunk
        sz = min(lane_chunk, hidden - lo)
        xc = x_ref[:, pl.ds(lo, sz)].astype(jnp.float32)
        ss = ss + jnp.sum(xc * xc, axis=-1, keepdims=True)

    inv = lax.rsqrt(ss * (1.0 / hidden) + eps)  # (tile_r, 1)

    for c in range(n_chunks):
        lo = c * lane_chunk
        sz = min(lane_chunk, hidden - lo)
        xc = x_ref[:, pl.ds(lo, sz)].astype(jnp.float32)
        o_ref[:, pl.ds(lo, sz)] = (xc * inv).astype(o_ref.dtype)


def _rmsnorm_folded_kernel(x_ref, o_ref, *, eps: float, hidden: int, fold: int):
    """Lane-dense path for H < 128: `fold` original rows packed into 128 lanes.

    Segmented per-original-row reduction and broadcast-back are two tiny MXU
    matmuls against a 0/1 segment-indicator matrix (keeps everything lane-dense,
    no cross-lane reshapes or masked partial stores).
    """
    fh = fold * hidden  # == 128 by construction
    lane = lax.broadcasted_iota(jnp.int32, (fh, fold), 0)
    segi = lax.broadcasted_iota(jnp.int32, (fh, fold), 1)
    seg = ((lane >= segi * hidden) & (lane < (segi + 1) * hidden)).astype(jnp.float32)

    lane_t = lax.broadcasted_iota(jnp.int32, (fold, fh), 1)
    segi_t = lax.broadcasted_iota(jnp.int32, (fold, fh), 0)
    seg_t = ((lane_t >= segi_t * hidden) & (lane_t < (segi_t + 1) * hidden)).astype(jnp.float32)

    x = x_ref[...].astype(jnp.float32)                                   # (tile_r, 128)
    ss = jnp.dot(x * x, seg, preferred_element_type=jnp.float32)         # (tile_r, fold)
    inv = lax.rsqrt(ss * (1.0 / hidden) + eps)                           # (tile_r, fold)
    inv_b = jnp.dot(inv, seg_t, preferred_element_type=jnp.float32)      # (tile_r, 128)
    o_ref[...] = (x * inv_b).astype(o_ref.dtype)


def _round_up(x: int, m: int) -> int:
    return ((x + m - 1) // m) * m


def _pick_tile_rows(rows: int, hidden: int, itemsize: int) -> tuple[int, int]:
    """Choose tile_rows and a matching scoped-VMEM limit (bytes)."""
    # Sublane packing: 8 rows per vreg for 32-bit, 16 for bf16, 32 for int8/fp8.
    min_sublane = 8 * max(1, 4 // itemsize)

    try:
        vmem_phys = int(pltpu.get_tpu_info().vmem_capacity_bytes)
    except Exception:
        vmem_phys = 64 << 20  # conservative (v7x-sized) fallback
    buf_budget = min(32 << 20, vmem_phys // 3)

    if rows <= min_sublane:
        # Full-array block along rows is always a legal block shape.
        tile_rows = rows
    else:
        # in+out double-buffered pipeline buffers plus f32 upcast chunk
        # temporaries for sub-32-bit inputs (matters on v7x's 64 MiB VMEM).
        f32_temp = 0 if itemsize >= 4 else 2 * hidden * 4
        bytes_per_tile_row = 4 * hidden * itemsize + f32_temp
        cap_rows = max(min_sublane, buf_budget // bytes_per_tile_row)
        # Keep the grid at >= ~8 steps whenever rows permit so the DMA pipeline
        # actually overlaps and the row axis can shard across v7x's two TCs.
        even_rows = max(min_sublane, (rows // 8 // min_sublane) * min_sublane)
        tile_rows = min(int(cap_rows), 1024, even_rows, _round_up(rows, min_sublane))
        tile_rows = max(min_sublane, (tile_rows // min_sublane) * min_sublane)
        # Prefer a tile_rows that (nearly) divides rows so the trailing masked
        # block wastes as little DMA / compute as possible.
        best, best_waste = tile_rows, (-rows) % tile_rows
        t = tile_rows
        for _ in range(16):
            if best_waste == 0:
                break
            t -= min_sublane
            if t < min_sublane:
                break
            waste = (-rows) % t
            if waste < best_waste:
                best, best_waste = t, waste
        tile_rows = best

    buffers_total = 4 * tile_rows * hidden * itemsize  # 2 bufs x (in + out)
    vmem_limit = max(buffers_total + (8 << 20), 32 << 20)
    # Stay well under ~48 MiB so v7x (64 MiB physical VMEM) keeps headroom.
    vmem_limit = min(vmem_limit, max(32 << 20, min(vmem_phys - (16 << 20), 48 << 20)))
    return tile_rows, int(vmem_limit)


def transformer_rms_norm(x: jax.Array, eps: float = 1e-7) -> jax.Array:
    """RMS-normalize over the last axis (no affine), matching TransformerRMSNorm."""
    orig_shape = x.shape
    hidden = orig_shape[-1]
    rows = 1
    for d in orig_shape[:-1]:
        rows *= d

    # Lane-dense small-H path: fold 128 // hidden rows into the lane axis so
    # every vreg and every store uses all 128 lanes.
    fold = 1
    if hidden < 128 and 128 % hidden == 0:
        f = 128 // hidden
        if f > 1 and rows % f == 0:
            fold = f
    rows_eff = rows // fold
    hidden_eff = hidden * fold

    x2d = x.reshape(rows_eff, hidden_eff)
    itemsize = jnp.dtype(x.dtype).itemsize
    tile_rows, vmem_limit = _pick_tile_rows(rows_eff, hidden_eff, itemsize)

    if fold > 1:
        kernel = functools.partial(
            _rmsnorm_folded_kernel, eps=float(eps), hidden=hidden, fold=fold)
    else:
        lane_chunk = hidden if hidden <= 2048 else 1024
        kernel = functools.partial(
            _rmsnorm_kernel, eps=float(eps), hidden=hidden, lane_chunk=lane_chunk)

    grid = (pl.cdiv(rows_eff, tile_rows),)

    # TODO(synk): on v7x, confirm in the profile that ("parallel",) shards the
    # row grid across both TensorCores; if not, switch to pltpu.CORE_PARALLEL
    # or an explicit pl.core_map split of the row range.
    out = pl.pallas_call(
        kernel,
        out_shape=jax.ShapeDtypeStruct((rows_eff, hidden_eff), x.dtype),
        grid_spec=pltpu.PrefetchScalarGridSpec(
            num_scalar_prefetch=0,
            grid=grid,
            in_specs=[pl.BlockSpec((tile_rows, hidden_eff), lambda i: (i, 0))],
            out_specs=pl.BlockSpec((tile_rows, hidden_eff), lambda i: (i, 0)),
        ),
        compiler_params=pltpu.CompilerParams(
            dimension_semantics=("parallel",),
            vmem_limit_bytes=vmem_limit,
        ),
        cost_estimate=pl.CostEstimate(
            flops=3 * rows * hidden,
            transcendentals=rows,
            bytes_accessed=2 * rows * hidden * itemsize,
        ),
    )(x2d)

    return out.reshape(orig_shape)


def _reference(x, eps=1e-7):
    xf = x.astype(jnp.float32)
    ms = jnp.mean(xf * xf, axis=-1, keepdims=True)
    return (xf * lax.rsqrt(ms + eps)).astype(x.dtype)


if __name__ == "__main__":
    key = jax.random.PRNGKey(0)
    k1, k2 = jax.random.split(key)

    # shapes implied by a transformer input: (batch=2, seq=8, hidden=32)
    # hidden=32 < 128 exercises the lane-dense folded path.
    x_small = jax.random.normal(k1, (2, 8, 32), dtype=jnp.float32)
    y = jax.block_until_ready(transformer_rms_norm(x_small, eps=1e-7))
    y_ref = _reference(x_small, eps=1e-7)
    assert y.shape == x_small.shape and y.dtype == x_small.dtype
    assert jnp.allclose(y, y_ref, atol=1e-5, rtol=1e-5), "mismatch vs reference (folded path)"

    # hidden >= 128 exercises the plain per-row path.
    x_wide = jax.random.normal(k2, (2, 4, 256), dtype=jnp.float32)
    y2 = jax.block_until_ready(transformer_rms_norm(x_wide, eps=1e-7))
    y2_ref = _reference(x_wide, eps=1e-7)
    assert y2.shape == x_wide.shape and y2.dtype == x_wide.dtype
    assert jnp.allclose(y2, y2_ref, atol=1e-5, rtol=1e-5), "mismatch vs reference (plain path)"

    print("KERNEL_OK")
</pallas_src>

<mosaic_0001>
module attributes {stable_mosaic.version = 11 : i64} {
  func.func @_rmsnorm_folded_kernel(%arg0: i32, %arg1: memref<4x128xf32, #tpu.memory_space<vmem>>, %arg2: memref<4x128xf32, #tpu.memory_space<vmem>>) attributes {dimension_semantics = [#tpu.dimension_semantics<parallel>], iteration_bounds = array<i64: 1>, scalar_prefetch = 0 : i64, scratch_operands = 0 : i64, tpu.core_type = #tpu.core_type<tc>, window_params = [{transform_indices = @transform_0, window_bounds = array<i64: 4, 128>}, {transform_indices = @transform_1, window_bounds = array<i64: 4, 128>}]} {
    %0 = tpu.iota {dimensions = array<i32: 0>} : vector<128x4xi32>
    %1 = tpu.iota {dimensions = array<i32: 1>} : vector<128x4xi32>
    %c32_i32 = arith.constant 32 : i32
    %2 = vector.broadcast %c32_i32 : i32 to vector<128x4xi32>
    %3 = arith.muli %1, %2 : vector<128x4xi32>
    %4 = arith.cmpi sge, %0, %3 : vector<128x4xi32>
    %c1_i32 = arith.constant 1 : i32
    %5 = vector.broadcast %c1_i32 : i32 to vector<128x4xi32>
    %6 = arith.addi %1, %5 : vector<128x4xi32>
    %c32_i32_0 = arith.constant 32 : i32
    %7 = vector.broadcast %c32_i32_0 : i32 to vector<128x4xi32>
    %8 = arith.muli %6, %7 : vector<128x4xi32>
    %9 = arith.cmpi slt, %0, %8 : vector<128x4xi32>
    %10 = arith.andi %4, %9 : vector<128x4xi1>
    %11 = arith.extui %10 : vector<128x4xi1> to vector<128x4xi32>
    %12 = arith.sitofp %11 : vector<128x4xi32> to vector<128x4xf32>
    %13 = tpu.iota {dimensions = array<i32: 1>} : vector<4x128xi32>
    %14 = tpu.iota {dimensions = array<i32: 0>} : vector<4x128xi32>
    %c32_i32_1 = arith.constant 32 : i32
    %15 = vector.broadcast %c32_i32_1 : i32 to vector<4x128xi32>
    %16 = arith.muli %14, %15 : vector<4x128xi32>
    %17 = arith.cmpi sge, %13, %16 : vector<4x128xi32>
    %c1_i32_2 = arith.constant 1 : i32
    %18 = vector.broadcast %c1_i32_2 : i32 to vector<4x128xi32>
    %19 = arith.addi %14, %18 : vector<4x128xi32>
    %c32_i32_3 = arith.constant 32 : i32
    %20 = vector.broadcast %c32_i32_3 : i32 to vector<4x128xi32>
    %21 = arith.muli %19, %20 : vector<4x128xi32>
    %22 = arith.cmpi slt, %13, %21 : vector<4x128xi32>
    %23 = arith.andi %17, %22 : vector<4x128xi1>
    %24 = arith.extui %23 : vector<4x128xi1> to vector<4x128xi32>
    %25 = arith.sitofp %24 : vector<4x128xi32> to vector<4x128xf32>
    %c0 = arith.constant 0 : index
    %c0_4 = arith.constant 0 : index
    %26 = vector.load %arg1[%c0, %c0_4] : memref<4x128xf32, #tpu.memory_space<vmem>>, vector<4x128xf32>
    %27 = arith.mulf %26, %26 : vector<4x128xf32>
    %cst = arith.constant dense<0.000000e+00> : vector<4x4xf32>
    %28 = tpu.matmul %27, %12, %cst {dimension_numbers = #tpu.dot_dimension_numbers<[1], [0], [0], [1], [0, 0, 1, 1], [], []>} : vector<4x128xf32>, vector<128x4xf32>, vector<4x4xf32> -> vector<4x4xf32>
    %cst_5 = arith.constant 3.125000e-02 : f32
    %29 = vector.broadcast %cst_5 : f32 to vector<4x4xf32>
    %30 = arith.mulf %28, %29 : vector<4x4xf32>
    %cst_6 = arith.constant 1.000000e-07 : f32
    %31 = vector.broadcast %cst_6 : f32 to vector<4x4xf32>
    %32 = arith.addf %30, %31 : vector<4x4xf32>
    %33 = math.rsqrt %32 : vector<4x4xf32>
    %cst_7 = arith.constant dense<0.000000e+00> : vector<4x128xf32>
    %34 = tpu.matmul %33, %25, %cst_7 {dimension_numbers = #tpu.dot_dimension_numbers<[1], [0], [0], [1], [0, 0, 1, 1], [], []>} : vector<4x4xf32>, vector<4x128xf32>, vector<4x128xf32> -> vector<4x128xf32>
    %35 = arith.mulf %26, %34 : vector<4x128xf32>
    %c0_8 = arith.constant 0 : index
    %c0_9 = arith.constant 0 : index
    %36 = vector.load %arg2[%c0_8, %c0_9] : memref<4x128xf32, #tpu.memory_space<vmem>>, vector<4x128xf32>
    tpu.vector_store %arg2[%c0_8, %c0_9], %35 {strides = array<i32>} : memref<4x128xf32, #tpu.memory_space<vmem>>, vector<4x128xf32>,
    return
  }
  func.func @transform_0(%arg0: i32) -> (i32, i32) {
    %c0_i32 = arith.constant 0 : i32
    %c0_i32_0 = arith.constant 0 : i32
    return %arg0, %c0_i32 : i32, i32
  }
  func.func @transform_1(%arg0: i32) -> (i32, i32) {
    %c0_i32 = arith.constant 0 : i32
    %c0_i32_0 = arith.constant 0 : i32
    return %arg0, %c0_i32 : i32, i32
  }
}

</mosaic_0001>

<bundles_post_ra>
// kernel: tpu_custom_call.1
= control target key start
LH: loop header
LB: loop body
LE: loop exit
PB: predicated region body
PF: predicated region fallthrough
CT: control target
= control target key end

     0   :  { %6 = vsyncpa [#allocation3], 0  ;;  %s640_s0 = inlined_call_operand.hbm [shape: f32[4,128], index: 0, kind: input, shape index: {}]   ;;  %s641_s1 = inlined_call_operand.hbm [shape: f32[4,128], index: 1, kind: output, shape index: {}]  }
   0x1   :  { %7 = vsyncpa [#allocation4], 0  ;;  %s475_s6 = smov [#allocation2]   ;;  %s427_s10 = scalar_lea.hbm %s640_s0, 64 }
   0x2   :  { %s14_s7 = sshll.u32 %s475_s6, 4  ;;  %p428_p0 = scmp.ne.s32.totalorder %s640_s0, %s427_s10  ;;  %s15_s7 = int_to_ptr.vmem [resolvable:$true] %s14_s7 }
   0x3   :  { %p431_p1 = scmp.lt.u32.totalorder %s427_s10, %s640_s0 }
   0x5   :  { %p433_p2 = pnand %p431_p1, %p428_p0 }
   0x7   :  { %436 = shalt.err (!%p433_p2)
}
   0x8   :  { %s437_s15 = scalar_lea.vmem %s15_s7, 64  ;;  %p442_p4 = scmp.lt.s32.totalorder %s15_s7, %s15_s7 }
   0x9   :  { %p438_p3 = scmp.ne.s32.totalorder %s15_s7, %s437_s15  ;;  %p443_p5 = scmp.lt.s32.totalorder %s437_s15, %s437_s15 }
   0xb   :  { %p444_p6 = por %p443_p5, %p442_p4 }
   0xd   :  { %p445_p7 = pnand %p444_p6, %p438_p3 }
   0xf   :  { %448 = shalt.err (!%p445_p7)
}
  0x10   :  { %17 = dma.hbm_to_vmem [thread:$0]  %s640_s0, 64, %s15_s7, [#allocation3]   ;;  %v21_v0 = vlaneseq }
  0x11   :  { %471 = dma.done.wait [#allocation3], 64  }
  0x12   :  { %472 = vsyncadd [#allocation3], 4294967232  ;;  %v476_v1 = vmov 0.0|0.0   ;;  %v477_v2 = vmov 0.0   ;;  %v505_v3 = vshrl.u32 %v21_v0, 7  ;;  %v507_v4 = vand.u32 127, %v21_v0 }
  0x13   :  { %395 = vmatprep.subr.bf16.mxu0 %v476_v1  ;;  %390 = vmatprep.subr.mxu1 %v477_v2  ;;  %vm478_vm0 = vmmov 0   ;;  %v479_v14 = vmov 1.0|1.0   ;;  %v131_v31 = vld [vmem:[#allocation2] sm:$0xf]  ;;  %s480_s0 = smov [#allocation5]  }
  0x14   :  { %387 = vmatprep.mubr.msk.f32.mxu0 %vm478_vm0, %v477_v2  ;;  %392 = vmatprep.mubr.msk.f32.mxu1 %vm478_vm0, %v477_v2  ;;  %v23_v5 = vadd.s32 8, %v505_v3  ;;  %v513_v6 = vmul.u32 32, %v507_v4  ;;  %v57_v7 = vadd.s32 1, %v507_v4  ;;  %v24_v8 = vadd.s32 16, %v505_v3  ;;  %s292_s18 = sshll.u32 %s480_s0, 4  ;;  %s293_s18 = int_to_ptr.vmem [resolvable:$true] %s292_s18 }
  0x15   :  { %v25_v10 = vadd.s32 24, %v505_v3  ;;  %v26_v11 = vadd.s32 32, %v505_v3  ;;  %v27_v12 = vadd.s32 40, %v505_v3  ;;  %v28_v13 = vadd.s32 48, %v505_v3  ;;  %s449_s19 = scalar_lea.vmem %s293_s18, 64  ;;  %p454_p9 = scmp.lt.s32.totalorder %s293_s18, %s293_s18 }
  0x16   :  { %vm41_vm1 = vcmp.ge.s32.totalorder %v505_v3, %v513_v6  ;;  %v519_v9 = vmul.u32 32, %v57_v7  ;;  %vm42_vm2 = vcmp.ge.s32.totalorder %v23_v5, %v513_v6  ;;  %vm43_vm6 = vcmp.ge.s32.totalorder %v24_v8, %v513_v6  ;;  %p450_p8 = scmp.ne.s32.totalorder %s293_s18, %s449_s19  ;;  %p455_p10 = scmp.lt.s32.totalorder %s449_s19, %s449_s19 }
  0x17   :  { %vm44_vm9 = vcmp.ge.s32.totalorder %v25_v10, %v513_v6  ;;  %vm45_vm13 = vcmp.ge.s32.totalorder %v26_v11, %v513_v6  ;;  %v29_v15 = vadd.s32 56, %v505_v3  ;;  %vm46_vm0 = vcmp.ge.s32.totalorder %v27_v12, %v513_v6 }
  0x18   :  { %vm59_vm3 = vcmp.lt.s32.totalorder %v505_v3, %v519_v9  ;;  %vm60_vm4 = vcmp.lt.s32.totalorder %v23_v5, %v519_v9  ;;  %vm61_vm7 = vcmp.lt.s32.totalorder %v24_v8, %v519_v9  ;;  %vm62_vm10 = vcmp.lt.s32.totalorder %v25_v10, %v519_v9  ;;  %p456_p11 = por %p455_p10, %p454_p9 }
  0x19   :  { %vm75_vm5 = vmand %vm41_vm1, %vm59_vm3  ;;  %vm63_vm14 = vcmp.lt.s32.totalorder %v26_v11, %v519_v9  ;;  %vm64_vm1 = vcmp.lt.s32.totalorder %v27_v12, %v519_v9  ;;  %v30_v16 = vadd.s32 64, %v505_v3  ;;  %v31_v18 = vadd.s32 72, %v505_v3 }
  0x1a   :  { %vm76_vm8 = vmand %vm42_vm2, %vm60_vm4  ;;  %vm47_vm4 = vcmp.ge.s32.totalorder %v28_v13, %v513_v6  ;;  %v32_v19 = vadd.s32 80, %v505_v3  ;;  %v33_v21 = vadd.s32 88, %v505_v3  ;;  %v34_v24 = vadd.s32 96, %v505_v3  ;;  %p457_p12 = pnand %p456_p11, %p450_p8 }
  0x1b   :  { %vm396_vm11 = vmpackc.low %vm76_vm8, %vm75_vm5  ;;  %vm65_vm5 = vcmp.lt.s32.totalorder %v28_v13, %v519_v9  ;;  %vm66_vm8 = vcmp.lt.s32.totalorder %v29_v15, %v519_v9  ;;  %v35_v26 = vadd.s32 104, %v505_v3  ;;  %v36_v29 = vadd.s32 112, %v505_v3 }
  0x1c   :  { %397 = vmatpush3.bf16.msk.msra.mxu0 %vm396_vm11, %v479_v14  ;;  %vm77_vm12 = vmand %vm43_vm6, %vm61_vm7  ;;  %vm48_vm7 = vcmp.ge.s32.totalorder %v29_v15, %v513_v6  ;;  %vm49_vm11 = vcmp.ge.s32.totalorder %v30_v16, %v513_v6  ;;  %v37_v30 = vadd.s32 120, %v505_v3  ;;  %v132_v32 = vmul.f32 %v131_v31, %v131_v31 }
  0x1d   :  { %398 = vmatprep.subr.bf16.mxu0 %v476_v1  ;;  %vm78_vm15 = vmand %vm44_vm9, %vm62_vm10  ;;  %v123_v33 = vmul.u32 32, %v505_v3  ;;  %v125_v34 = vadd.s32 1, %v505_v3 }
  0x1e   :  { %vm399_vm2 = vmpackc.low %vm78_vm15, %vm77_vm12  ;;  %vm67_vm12 = vcmp.lt.s32.totalorder %v30_v16, %v519_v9  ;;  %vm68_vm15 = vcmp.lt.s32.totalorder %v31_v18, %v519_v9 }
  0x1f   :  { %vm541_vm3 = vmand %vm45_vm13, %vm63_vm14  ;;  %vm50_vm14 = vcmp.ge.s32.totalorder %v31_v18, %v513_v6  ;;  %v126_v35 = vmul.u32 32, %v125_v34 }
  0x20   :  { %400 = vmatpush3.bf16.msk.msra.mxu0 %vm399_vm2, %v479_v14  ;;  %vm80_vm6 = vmand %vm46_vm0, %vm64_vm1  ;;  %vm51_vm2 = vcmp.ge.s32.totalorder %v32_v19, %v513_v6 }
  0x21   :  { %401 = vmatprep.subr.bf16.mxu0 %v476_v1  ;;  %vm402_vm9 = vmpackc.low %vm80_vm6, %vm541_vm3  ;;  %vm69_vm3 = vcmp.lt.s32.totalorder %v32_v19, %v519_v9  ;;  %vm70_vm6 = vcmp.lt.s32.totalorder %v33_v21, %v519_v9 }
  0x22   :  { %vm555_vm10 = vmand %vm47_vm4, %vm65_vm5  ;;  %vm52_vm5 = vcmp.ge.s32.totalorder %v33_v21, %v513_v6 }
  0x23   :  { %vm562_vm13 = vmand %vm48_vm7, %vm66_vm8 }
  0x24   :  { %403 = vmatpush3.bf16.msk.msra.mxu0 %vm402_vm9, %v479_v14  ;;  %vm405_vm0 = vmpackc.low %vm562_vm13, %vm555_vm10  ;;  %vm53_vm10 = vcmp.ge.s32.totalorder %v34_v24, %v513_v6  ;;  %vm72_vm13 = vcmp.lt.s32.totalorder %v35_v26, %v519_v9 }
  0x25   :  { %404 = vmatprep.subr.bf16.mxu0 %v476_v1  ;;  %vm574_vm1 = vmand %vm49_vm11, %vm67_vm12  ;;  %vm71_vm11 = vcmp.lt.s32.totalorder %v34_v24, %v519_v9  ;;  %vm54_vm12 = vcmp.ge.s32.totalorder %v35_v26, %v513_v6 }
  0x26   :  { %vm581_vm4 = vmand %vm50_vm14, %vm68_vm15 }
  0x27   :  { %vm408_vm7 = vmpackc.low %vm581_vm4, %vm574_vm1  ;;  %vm55_vm1 = vcmp.ge.s32.totalorder %v36_v29, %v513_v6  ;;  %vm74_vm4 = vcmp.lt.s32.totalorder %v37_v30, %v519_v9 }
  0x28   :  { %406 = vmatpush3.bf16.msk.msra.mxu0 %vm405_vm0, %v479_v14  ;;  %vm593_vm8 = vmand %vm51_vm2, %vm69_vm3  ;;  %vm73_vm2 = vcmp.lt.s32.totalorder %v36_v29, %v519_v9  ;;  %vm56_vm3 = vcmp.ge.s32.totalorder %v37_v30, %v513_v6 }
  0x29   :  { %407 = vmatprep.subr.bf16.mxu0 %v476_v1  ;;  %vm598_vm9 = vmand %vm52_vm5, %vm70_vm6 }
  0x2a   :  { %vm411_vm14 = vmpackc.low %vm598_vm9, %vm593_vm8  ;;  %vm124_vm9 = vcmp.ge.s32.totalorder %v507_v4, %v123_v33 }
  0x2b   :  { %vm87_vm15 = vmand %vm53_vm10, %vm71_vm11  ;;  %vm127_vm10 = vcmp.lt.s32.totalorder %v507_v4, %v126_v35  ;;  %vm210_vm11 = vcmask 1043456  }
  0x2c   :  { %409 = vmatpush3.bf16.msk.msra.mxu0 %vm408_vm7, %v479_v14  ;;  %vm88_vm0 = vmand %vm54_vm12, %vm72_vm13  ;;  %vm206_vm13 = vcmask 31744  }
  0x2d   :  { %410 = vmatprep.subr.bf16.mxu0 %v476_v1  ;;  %vm414_vm5 = vmpackc.low %vm88_vm0, %vm87_vm15 }
  0x2e   :  { %vm89_vm6 = vmand %vm55_vm1, %vm73_vm2 }
  0x2f   :  { %vm90_vm8 = vmand %vm56_vm3, %vm74_vm4 }
  0x30   :  { %412 = vmatpush3.bf16.msk.msra.mxu0 %vm411_vm14, %v479_v14  ;;  %vm417_vm7 = vmpackc.low %vm90_vm8, %vm89_vm6 }
  0x31   :  { %413 = vmatprep.subr.bf16.mxu0 %v476_v1  ;;  %vm128_vm12 = vmand %vm124_vm9, %vm127_vm10 }
  0x32   :  { %v317_v36 = vsel %vm128_vm12, 1.0, %v477_v2 }
  0x33   :  { %391 = vmatpush3.msk.msra.mxu1 %vm210_vm11, %v317_v36 }
  0x34   :  { %415 = vmatpush3.bf16.msk.msra.mxu0 %vm414_vm5, %v479_v14 }
  0x35   :  { %416 = vmatprep.subr.bf16.mxu0 %v476_v1 }
  0x38   :  { %418 = vmatpush3.bf16.msk.msra.mxu0 %vm417_vm7, %v479_v14 }
  0x3b   :  { %388 = vmatmul.mubr.f32.vlgmr.msra.gmra.mrb[0].mxu0 %v132_v32 }
 0x10e   :  { %v199_v37 = vpop.f32.mrb[0].mxu0 }
 0x10f   :  { %v203_v38 = vmul.f32 0.03125, %v199_v37  ;;  %v389_v39 = vpop.f32.mrb[1].mxu0 }
 0x111   :  { %v204_v40 = vadd.f32 1e-07, %v203_v38 }
 0x113   :  { %425 = vrsqrt.f32 %v204_v40 }
 0x11d   :  { %v426_v41 = vpop.eup %425 }
 0x11e   :  { %393 = vmatmul.mubr.msk.f32.vlgmr.msra.gmra.mrb[0].mxu1 %vm206_vm13, %v426_v41 }
 0x1f1   :  { %v280_v42 = vpop.f32.mrb[0].mxu1 }
 0x1f2   :  { %v284_v43 = vmul.f32 %v280_v42, %v131_v31  ;;  %v394_v44 = vpop.f32.mrb[1].mxu1 }
 0x1f4   :  { %285 = vst [vmem:[#allocation5] sm:$0xf] %v284_v43 }
 0x1f5   :  { %460 = shalt.err (!%p457_p12)
}
 0x1f6   :  { %s461_s22 = scalar_lea.hbm %s641_s1, 64 }
 0x1f7   :  { %p462_p13 = scmp.ne.s32.totalorder %s641_s1, %s461_s22  ;;  %p465_p0 = scmp.lt.u32.totalorder %s461_s22, %s641_s1 }
 0x1f9   :  { %p467_p1 = pnand %p465_p0, %p462_p13 }
 0x1fb   :  { %470 = shalt.err (!%p467_p1)
}
 0x1fc   :  { %295 = dma.vmem_to_hbm [thread:$0]  %s293_s18, 64, %s641_s1, [#allocation4]  }
 0x1fd   :  { %473 = dma.done.wait [#allocation4], 64  }
 0x1fe   :  { %474 = vsyncadd [#allocation4], 4294967232 }
 0x1ff   :  { %299 = vsyncpa [#allocation3], 1 }
 0x200   :  { %300 = vsyncpa [#allocation4], 1 }

</bundles_post_ra>
